<compile_context>
chip_gen: v7x
topology: tpu7x:2x2x1
jax: 0.10.0
libtpu: 0.0.40
codegen_flags: <defaults>
</compile_context>

<pallas_src>
import jax
import jax.numpy as jnp
from jax.experimental import pallas as pl
from jax.experimental.pallas import tpu as pltpu

_LANE_CANDIDATES = (4096, 2048, 1024, 512, 256, 128)
_TILE_BYTE_BUDGET = 4 * 1024 * 1024     # per-tile; 2 in-bufs + 2 out-bufs <= 16 MiB
_VMEM_LIMIT_BYTES = 32 * 1024 * 1024    # safe on v5e (raises 16 MiB default) and v7x (64 MiB phys)


def _copy_kernel(x_ref, o_ref):
    # Pass-through on the current VMEM tile (the entire forward() of the module).
    o_ref[...] = x_ref[...]


def _sublane_align(itemsize: int) -> int:
    # Packed vreg height per dtype width: f32 -> 8, bf16 -> 16, int8/fp8 -> 32.
    return {4: 8, 2: 16, 1: 32}.get(itemsize, 8)


def _pick_row_tile(rows: int, row_bytes: int, sublane: int) -> int:
    """Largest divisor of `rows` (preferring sublane-aligned) whose tile fits the byte budget."""
    max_rows = max(1, _TILE_BYTE_BUDGET // max(1, row_bytes))
    if rows <= max_rows:
        return rows
    # Largest sublane-aligned divisor <= max_rows.
    d = (max_rows // sublane) * sublane
    while d >= sublane:
        if rows % d == 0:
            return d
        d -= sublane
    # Fall back to any divisor <= max_rows (worst case 1).
    d = max_rows
    while d > 1:
        if rows % d == 0:
            return d
        d -= 1
    return 1


def _pallas_copy_2d(x2d: jax.Array) -> jax.Array:
    rows, cols = x2d.shape
    itemsize = jnp.dtype(x2d.dtype).itemsize
    sublane = _sublane_align(itemsize)
    tr = _pick_row_tile(rows, cols * itemsize, sublane)
    grid = (rows // tr,)

    return pl.pallas_call(
        _copy_kernel,
        out_shape=jax.ShapeDtypeStruct((rows, cols), x2d.dtype),
        grid=grid,
        in_specs=[pl.BlockSpec((tr, cols), lambda i: (i, 0))],
        out_specs=pl.BlockSpec((tr, cols), lambda i: (i, 0)),
        compiler_params=pltpu.CompilerParams(
            dimension_semantics=("parallel",),   # shards across v7x's 2 TensorCores
            vmem_limit_bytes=_VMEM_LIMIT_BYTES,
        ),
    )(x2d)


@jax.jit
def model_forward(x: jax.Array) -> jax.Array:
    """Pallas equivalent of Model.forward(x) -> x."""
    orig_shape = x.shape
    n = x.size
    if n == 0:
        return x  # nothing to copy

    # Prefer a lane-dense flat view: last dim a large multiple of 128.
    lane = None
    for cand in _LANE_CANDIDATES:
        if cand <= n and n % cand == 0:
            lane = cand
            break

    if lane is not None:
        x2d = x.reshape(n // lane, lane)
    elif x.ndim >= 2:
        x2d = x.reshape(-1, orig_shape[-1])   # awkward sizes: keep native last dim
    else:
        x2d = x.reshape(1, n)

    out2d = _pallas_copy_2d(x2d)
    return out2d.reshape(orig_shape)


if __name__ == "__main__":
    key = jax.random.PRNGKey(0)
    # Small NCHW-style input consistent with the module's generic tensor forward.
    x = jax.random.normal(key, (2, 4, 16, 16), dtype=jnp.float32)

    y = model_forward(x)
    y = jax.block_until_ready(y)

    assert y.shape == x.shape, (y.shape, x.shape)
    assert y.dtype == x.dtype, (y.dtype, x.dtype)
    assert bool(jnp.all(y == x)), "identity kernel mismatch"

    print("KERNEL_OK")
</pallas_src>

<mosaic_0001>
module attributes {stable_mosaic.version = 11 : i64} {
  func.func @_copy_kernel(%arg0: i32, %arg1: memref<1x2048xf32, #tpu.memory_space<vmem>>, %arg2: memref<1x2048xf32, #tpu.memory_space<vmem>>) attributes {dimension_semantics = [#tpu.dimension_semantics<parallel>], iteration_bounds = array<i64: 1>, scalar_prefetch = 0 : i64, scratch_operands = 0 : i64, tpu.core_type = #tpu.core_type<tc>, window_params = [{transform_indices = @transform_0, window_bounds = array<i64: 1, 2048>}, {transform_indices = @transform_1, window_bounds = array<i64: 1, 2048>}]} {
    %c0 = arith.constant 0 : index
    %c0_0 = arith.constant 0 : index
    %0 = vector.load %arg1[%c0, %c0_0] : memref<1x2048xf32, #tpu.memory_space<vmem>>, vector<1x2048xf32>
    %c0_1 = arith.constant 0 : index
    %c0_2 = arith.constant 0 : index
    %1 = vector.load %arg2[%c0_1, %c0_2] : memref<1x2048xf32, #tpu.memory_space<vmem>>, vector<1x2048xf32>
    tpu.vector_store %arg2[%c0_1, %c0_2], %0 {strides = array<i32>} : memref<1x2048xf32, #tpu.memory_space<vmem>>, vector<1x2048xf32>,
    return
  }
  func.func @transform_0(%arg0: i32) -> (i32, i32) {
    %c0_i32 = arith.constant 0 : i32
    %c0_i32_0 = arith.constant 0 : i32
    return %arg0, %c0_i32 : i32, i32
  }
  func.func @transform_1(%arg0: i32) -> (i32, i32) {
    %c0_i32 = arith.constant 0 : i32
    %c0_i32_0 = arith.constant 0 : i32
    return %arg0, %c0_i32 : i32, i32
  }
}

</mosaic_0001>

<bundles_post_ra>
// kernel: model_forward.1
= control target key start
LH: loop header
LB: loop body
LE: loop exit
PB: predicated region body
PF: predicated region fallthrough
CT: control target
= control target key end

     0   :  { %s38_s0 = inlined_call_operand.vmem [shape: f32[1,2048], index: 0, kind: input, shape index: {}]   ;;  %s39_s1 = inlined_call_operand.vmem [shape: f32[1,2048], index: 1, kind: output, shape index: {}]  }
   0x1   :  { %v8_v0 = vld [vmem:[%s38_s0] sm:$0xff]  ;;  %v9_v1 = vld [vmem:[%s38_s0 + $0x8] sm:$0xff] }
   0x2   :  { %10 = vst [vmem:[%s39_s1] sm:$0xff] %v8_v0  ;;  %11 = vst [vmem:[%s39_s1 + $0x8] sm:$0xff] %v9_v1 }

</bundles_post_ra>
